<compile_context>
chip_gen: v7x
topology: tpu7x:2x2x1
jax: 0.10.0
libtpu: 0.0.40
codegen_flags: <defaults>
</compile_context>

<pallas_src>
import functools
import math

import jax
import jax.numpy as jnp
from jax.experimental import pallas as pl
from jax.experimental.pallas import tpu as pltpu


def _msa_kernel(*refs, split_x, n_heads, d_head, compute_dtype, softmax_dtype,
                approx_recip):
    if split_x:
        xq_ref, xkv_ref, w_ref, b_ref, o_ref = refs
    else:
        xq_ref, w_ref, b_ref, o_ref = refs
        xkv_ref = xq_ref

    xq = xq_ref[0]                       # (H, TQ, dh)  compute_dtype
    xkv = xkv_ref[0]                     # (H, N,  dh)  compute_dtype

    wq, wk, wv = w_ref[0], w_ref[1], w_ref[2]    # (H, dh, dh) compute_dtype
    bq, bk, bv = b_ref[0], b_ref[1], b_ref[2]    # (H, 1,  dh) f32

    # Batched per-head Linear projections (H is the batch dim).  The softmax
    # scale 1/sqrt(dh) is folded into wq/bq on the host.
    q = jnp.einsum("hnd,hde->hne", xq, wq,
                   preferred_element_type=jnp.float32) + bq      # (H, TQ, dh)
    k = jnp.einsum("hnd,hde->hne", xkv, wk,
                   preferred_element_type=jnp.float32) + bk      # (H, N, dh)
    v = jnp.einsum("hnd,hde->hne", xkv, wv,
                   preferred_element_type=jnp.float32) + bv      # (H, N, dh)

    # Scores, f32 accumulation on the MXU.
    s = jnp.einsum("hqd,hkd->hqk",
                   q.astype(compute_dtype), k.astype(compute_dtype),
                   preferred_element_type=jnp.float32)           # (H, TQ, N)

    # Numerically stable softmax, normalized after the PV matmul.  The same
    # `p` feeds both the PV numerator and the (f32-accumulated) denominator.
    m = jnp.max(s, axis=-1, keepdims=True)
    e = jnp.exp((s - m).astype(softmax_dtype))   # bf16 EUP path on v6e/v7x
    p = e.astype(compute_dtype)
    denom = jnp.sum(p.astype(jnp.float32), axis=-1, keepdims=True)
    pv = jnp.einsum("hqk,hkd->hqd", p, v.astype(compute_dtype),
                    preferred_element_type=jnp.float32)          # (H, TQ, dh)
    inv = pl.reciprocal(denom, approx=approx_recip)
    out = pv * inv                                               # (H, TQ, dh) f32

    # torch.hstack column order: head h -> lanes [h*dh, (h+1)*dh).  The whole
    # (TQ, d) block is then written back to HBM as one lane-dense DMA.
    for h in range(n_heads):
        o_ref[0, :, h * d_head:(h + 1) * d_head] = out[h].astype(o_ref.dtype)


def _vmem_limit_bytes(n_heads, n, tq, d_head, d, compute_dtype, softmax_dtype,
                      out_dtype):
    cd = jnp.dtype(compute_dtype).itemsize
    sd = jnp.dtype(softmax_dtype).itemsize
    od = jnp.dtype(out_dtype).itemsize
    # Double-buffered pipeline blocks.
    blocks = 2 * (n_heads * tq * d_head * cd            # xq block
                  + n_heads * n * d_head * cd           # xkv block
                  + 3 * n_heads * d_head * d_head * cd  # fused weights
                  + 3 * n_heads * d_head * 4            # fused bias (f32)
                  + tq * d * od)                        # output block
    # Kernel-body intermediates.
    inter = n_heads * tq * n * (4 + sd + cd)                 # s, e, p
    inter += n_heads * (tq + 2 * n) * d_head * (4 + cd)      # q/k/v + casts
    inter += 2 * n_heads * tq * d_head * 4                   # pv, out
    est = blocks + inter + (4 << 20)                         # headroom
    # Floor at 32 MiB (>= default scoped VMEM everywhere), cap below v7x's
    # 64 MiB physical VMEM.
    return int(min(max(est, 32 << 20), 48 << 20))


def my_msa_pallas(x, wq, bq, wk, bk, wv, bv, *, n_heads,
                  compute_dtype=jnp.bfloat16, softmax_dtype=None,
                  out_dtype=None, block_q=None):
    """x: (B, N, d). wq/wk/wv: (H, d_head, d_head) in PyTorch (out,in) layout;
    bq/bk/bv: (H, d_head).

    compute_dtype : matmul operand dtype (bf16 default = v6e/v7x MXU fast path,
                    f32 accumulation always).  Pass jnp.float32 for exactness.
    softmax_dtype : dtype of the exp (defaults to compute_dtype).  On v5e pass
                    jnp.float32 (no bf16 VPU/EUP).
    out_dtype     : output dtype (defaults to x.dtype); pass bf16 to halve the
                    writeback DMA when downstream allows.
    block_q       : query-tile size (second "parallel" grid axis).
    """
    B, N, d = x.shape
    assert d % n_heads == 0, f"Can't divide dimension {d} into {n_heads} heads"
    d_head = d // n_heads
    if softmax_dtype is None:
        softmax_dtype = compute_dtype
    if out_dtype is None:
        out_dtype = x.dtype

    # Query-tile size for the second parallel grid axis (keeps both v7x TCs
    # busy even at B=1).  Fall back to the full sequence if it doesn't tile.
    if block_q is None:
        block_q = N if N <= 128 else 128
    if N % block_q != 0 or (block_q != N and block_q % 8 != 0):
        block_q = N
    n_q_tiles = N // block_q
    split_x = n_q_tiles > 1

    scale = 1.0 / math.sqrt(float(d_head))
    w_t = lambda w: jnp.swapaxes(w, -1, -2)   # nn.Linear: y = x @ W.T + b

    # Fused, pre-transposed weights; scale folded into the Q projection.
    w_all = jnp.stack([w_t(wq) * scale, w_t(wk), w_t(wv)], axis=0)   # (3,H,dh,dh)
    b_all = jnp.stack([bq * scale, bk, bv], axis=0)[:, :, None, :]   # (3,H,1,dh)

    # Head-major input layout (layout plumbing only): no d_head-wide lane
    # slices inside the kernel.
    x_h = jnp.transpose(x.reshape(B, N, n_heads, d_head), (0, 2, 1, 3))  # (B,H,N,dh)
    x_c = x_h.astype(compute_dtype)
    w_c = w_all.astype(compute_dtype)
    b_c = b_all.astype(jnp.float32)   # bias added after f32 accumulation

    kernel = functools.partial(
        _msa_kernel,
        split_x=split_x,
        n_heads=n_heads,
        d_head=d_head,
        compute_dtype=compute_dtype,
        softmax_dtype=softmax_dtype,
        approx_recip=(compute_dtype != jnp.float32),
    )

    xq_spec = pl.BlockSpec((1, n_heads, block_q, d_head),
                           lambda b, qi: (b, 0, qi, 0))
    xkv_spec = pl.BlockSpec((1, n_heads, N, d_head),
                            lambda b, qi: (b, 0, 0, 0))
    # Constant block indices -> weights/bias stay resident in VMEM.
    w_spec = pl.BlockSpec((3, n_heads, d_head, d_head),
                          lambda b, qi: (0, 0, 0, 0))
    b_spec = pl.BlockSpec((3, n_heads, 1, d_head),
                          lambda b, qi: (0, 0, 0, 0))
    o_spec = pl.BlockSpec((1, block_q, d), lambda b, qi: (b, qi, 0))

    if split_x:
        in_specs = [xq_spec, xkv_spec, w_spec, b_spec]
        args = (x_c, x_c, w_c, b_c)
    else:
        in_specs = [xkv_spec, w_spec, b_spec]
        args = (x_c, w_c, b_c)

    vmem_bytes = _vmem_limit_bytes(n_heads, N, block_q, d_head, d,
                                   compute_dtype, softmax_dtype, out_dtype)

    return pl.pallas_call(
        kernel,
        out_shape=jax.ShapeDtypeStruct((B, N, d), out_dtype),
        grid_spec=pltpu.PrefetchScalarGridSpec(
            num_scalar_prefetch=0,
            grid=(B, n_q_tiles),
            in_specs=in_specs,
            out_specs=o_spec,
        ),
        compiler_params=pltpu.CompilerParams(
            dimension_semantics=("parallel", "parallel"),
            vmem_limit_bytes=vmem_bytes,
        ),
    )(*args)


def my_msa_reference(x, wq, bq, wk, bk, wv, bv, *, n_heads):
    B, N, d = x.shape
    d_head = d // n_heads
    outs = []
    for h in range(n_heads):
        seq = x[:, :, h * d_head:(h + 1) * d_head]          # (B, N, d_head)
        q = jnp.einsum("bnd,od->bno", seq, wq[h]) + bq[h]
        k = jnp.einsum("bnd,od->bno", seq, wk[h]) + bk[h]
        v = jnp.einsum("bnd,od->bno", seq, wv[h]) + bv[h]
        s = jnp.einsum("bnd,bmd->bnm", q, k) / math.sqrt(d_head)
        a = jax.nn.softmax(s, axis=-1)
        outs.append(jnp.einsum("bnm,bmd->bnd", a, v))
    return jnp.concatenate(outs, axis=-1)


def _make_params(key, n_heads, d_head):
    kwq, kbq, kwk, kbk, kwv, kbv = jax.random.split(key, 6)
    bound = 1.0 / math.sqrt(d_head)
    u = lambda k, shp: jax.random.uniform(k, shp, jnp.float32, -bound, bound)
    wq = u(kwq, (n_heads, d_head, d_head)); bq = u(kbq, (n_heads, d_head))
    wk = u(kwk, (n_heads, d_head, d_head)); bk = u(kbk, (n_heads, d_head))
    wv = u(kwv, (n_heads, d_head, d_head)); bv = u(kbv, (n_heads, d_head))
    return wq, bq, wk, bk, wv, bv


if __name__ == "__main__":
    key = jax.random.PRNGKey(0)
    k1, k2, k3, k4 = jax.random.split(key, 4)

    # ---- Test 1: module-scale demo shapes (single query tile per batch) ----
    B, N, d, n_heads = 2, 8, 32, 2
    x = jax.random.normal(k1, (B, N, d), dtype=jnp.float32)
    wq, bq, wk, bk, wv, bv = _make_params(k2, n_heads, d // n_heads)
    ref = my_msa_reference(x, wq, bq, wk, bk, wv, bv, n_heads=n_heads)

    # Exact f32 path: must match the reference tightly.
    out = my_msa_pallas(x, wq, bq, wk, bk, wv, bv, n_heads=n_heads,
                        compute_dtype=jnp.float32)
    out = jax.block_until_ready(out)
    assert out.shape == (B, N, d)
    assert jnp.allclose(out, ref, atol=1e-5, rtol=1e-5), "f32 mismatch vs reference"

    # Default fast path (bf16 matmuls + bf16 exp, f32 accumulation).
    out_fast = my_msa_pallas(x, wq, bq, wk, bk, wv, bv, n_heads=n_heads)
    out_fast = jax.block_until_ready(out_fast)
    assert jnp.allclose(out_fast, ref, atol=5e-2, rtol=5e-2), "bf16 mismatch vs reference"

    # ---- Test 2: query-tiled path (2 query tiles -> 2-axis parallel grid) ----
    B2, N2, d2, H2 = 1, 256, 64, 4
    x2 = jax.random.normal(k3, (B2, N2, d2), dtype=jnp.float32)
    p2 = _make_params(k4, H2, d2 // H2)
    ref2 = my_msa_reference(x2, *p2, n_heads=H2)
    out2 = my_msa_pallas(x2, *p2, n_heads=H2, compute_dtype=jnp.float32,
                         block_q=128)
    out2 = jax.block_until_ready(out2)
    assert out2.shape == (B2, N2, d2)
    assert jnp.allclose(out2, ref2, atol=1e-4, rtol=1e-4), "tiled f32 mismatch"

    print("KERNEL_OK")
</pallas_src>

<mosaic_0001>
module attributes {stable_mosaic.version = 11 : i64} {
  func.func @_msa_kernel(%arg0: i32, %arg1: i32, %arg2: memref<1x2x8x16xf32, #tpu.memory_space<vmem>>, %arg3: memref<3x2x16x16xf32, #tpu.memory_space<vmem>>, %arg4: memref<3x2x1x16xf32, #tpu.memory_space<vmem>>, %arg5: memref<1x8x32xf32, #tpu.memory_space<vmem>>) attributes {dimension_semantics = [#tpu.dimension_semantics<parallel>, #tpu.dimension_semantics<parallel>], iteration_bounds = array<i64: 2, 1>, scalar_prefetch = 0 : i64, scratch_operands = 0 : i64, tpu.core_type = #tpu.core_type<tc>, window_params = [{transform_indices = @transform_0, window_bounds = array<i64: 1, 2, 8, 16>}, {pipeline_mode = #tpu.pipeline_mode<synchronous>, transform_indices = @transform_1, window_bounds = array<i64: 3, 2, 16, 16>}, {pipeline_mode = #tpu.pipeline_mode<synchronous>, transform_indices = @transform_2, window_bounds = array<i64: 3, 2, 1, 16>}, {transform_indices = @transform_3, window_bounds = array<i64: 1, 8, 32>}]} {
    %c0 = arith.constant 0 : index
    %c0_0 = arith.constant 0 : index
    %c0_1 = arith.constant 0 : index
    %c0_2 = arith.constant 0 : index
    %0 = vector.load %arg2[%c0, %c0_0, %c0_1, %c0_2] : memref<1x2x8x16xf32, #tpu.memory_space<vmem>>, vector<1x2x8x16xf32>
    %1 = vector.shape_cast %0 : vector<1x2x8x16xf32> to vector<2x8x16xf32>
    %c0_3 = arith.constant 0 : index
    %c0_4 = arith.constant 0 : index
    %c0_5 = arith.constant 0 : index
    %c0_6 = arith.constant 0 : index
    %2 = vector.load %arg2[%c0_3, %c0_4, %c0_5, %c0_6] : memref<1x2x8x16xf32, #tpu.memory_space<vmem>>, vector<1x2x8x16xf32>
    %3 = vector.shape_cast %2 : vector<1x2x8x16xf32> to vector<2x8x16xf32>
    %c0_7 = arith.constant 0 : index
    %c0_8 = arith.constant 0 : index
    %c0_9 = arith.constant 0 : index
    %c0_10 = arith.constant 0 : index
    %4 = vector.load %arg3[%c0_7, %c0_8, %c0_9, %c0_10] : memref<3x2x16x16xf32, #tpu.memory_space<vmem>>, vector<1x2x16x16xf32>
    %5 = vector.shape_cast %4 : vector<1x2x16x16xf32> to vector<2x16x16xf32>
    %c1 = arith.constant 1 : index
    %c0_11 = arith.constant 0 : index
    %c0_12 = arith.constant 0 : index
    %c0_13 = arith.constant 0 : index
    %6 = vector.load %arg3[%c1, %c0_11, %c0_12, %c0_13] : memref<3x2x16x16xf32, #tpu.memory_space<vmem>>, vector<1x2x16x16xf32>
    %7 = vector.shape_cast %6 : vector<1x2x16x16xf32> to vector<2x16x16xf32>
    %c2 = arith.constant 2 : index
    %c0_14 = arith.constant 0 : index
    %c0_15 = arith.constant 0 : index
    %c0_16 = arith.constant 0 : index
    %8 = vector.load %arg3[%c2, %c0_14, %c0_15, %c0_16] : memref<3x2x16x16xf32, #tpu.memory_space<vmem>>, vector<1x2x16x16xf32>
    %9 = vector.shape_cast %8 : vector<1x2x16x16xf32> to vector<2x16x16xf32>
    %c0_17 = arith.constant 0 : index
    %c0_18 = arith.constant 0 : index
    %c0_19 = arith.constant 0 : index
    %c0_20 = arith.constant 0 : index
    %10 = vector.load %arg4[%c0_17, %c0_18, %c0_19, %c0_20] : memref<3x2x1x16xf32, #tpu.memory_space<vmem>>, vector<1x2x1x16xf32>
    %11 = vector.shape_cast %10 : vector<1x2x1x16xf32> to vector<2x1x16xf32>
    %c1_21 = arith.constant 1 : index
    %c0_22 = arith.constant 0 : index
    %c0_23 = arith.constant 0 : index
    %c0_24 = arith.constant 0 : index
    %12 = vector.load %arg4[%c1_21, %c0_22, %c0_23, %c0_24] : memref<3x2x1x16xf32, #tpu.memory_space<vmem>>, vector<1x2x1x16xf32>
    %13 = vector.shape_cast %12 : vector<1x2x1x16xf32> to vector<2x1x16xf32>
    %c2_25 = arith.constant 2 : index
    %c0_26 = arith.constant 0 : index
    %c0_27 = arith.constant 0 : index
    %c0_28 = arith.constant 0 : index
    %14 = vector.load %arg4[%c2_25, %c0_26, %c0_27, %c0_28] : memref<3x2x1x16xf32, #tpu.memory_space<vmem>>, vector<1x2x1x16xf32>
    %15 = vector.shape_cast %14 : vector<1x2x1x16xf32> to vector<2x1x16xf32>
    "tpu.trace_start"() <{level = 10 : i32, message = "hnd,hde->hne"}> : () -> ()
    %cst = arith.constant dense<0.000000e+00> : vector<2x8x16xf32>
    %16 = tpu.matmul %1, %5, %cst {dimension_numbers = #tpu.dot_dimension_numbers<[2], [1], [1], [2], [0, 0, 0, 1, 1, 2], [0], [0]>} : vector<2x8x16xf32>, vector<2x16x16xf32>, vector<2x8x16xf32> -> vector<2x8x16xf32>
    "tpu.trace_stop"() : () -> ()
    %17 = vector.broadcast %11 : vector<2x1x16xf32> to vector<2x8x16xf32>
    %18 = arith.addf %16, %17 : vector<2x8x16xf32>
    "tpu.trace_start"() <{level = 10 : i32, message = "hnd,hde->hne"}> : () -> ()
    %cst_29 = arith.constant dense<0.000000e+00> : vector<2x8x16xf32>
    %19 = tpu.matmul %3, %7, %cst_29 {dimension_numbers = #tpu.dot_dimension_numbers<[2], [1], [1], [2], [0, 0, 0, 1, 1, 2], [0], [0]>} : vector<2x8x16xf32>, vector<2x16x16xf32>, vector<2x8x16xf32> -> vector<2x8x16xf32>
    "tpu.trace_stop"() : () -> ()
    %20 = vector.broadcast %13 : vector<2x1x16xf32> to vector<2x8x16xf32>
    %21 = arith.addf %19, %20 : vector<2x8x16xf32>
    "tpu.trace_start"() <{level = 10 : i32, message = "hnd,hde->hne"}> : () -> ()
    %cst_30 = arith.constant dense<0.000000e+00> : vector<2x8x16xf32>
    %22 = tpu.matmul %3, %9, %cst_30 {dimension_numbers = #tpu.dot_dimension_numbers<[2], [1], [1], [2], [0, 0, 0, 1, 1, 2], [0], [0]>} : vector<2x8x16xf32>, vector<2x16x16xf32>, vector<2x8x16xf32> -> vector<2x8x16xf32>
    "tpu.trace_stop"() : () -> ()
    %23 = vector.broadcast %15 : vector<2x1x16xf32> to vector<2x8x16xf32>
    %24 = arith.addf %22, %23 : vector<2x8x16xf32>
    "tpu.trace_start"() <{level = 10 : i32, message = "hqd,hkd->hqk"}> : () -> ()
    %cst_31 = arith.constant dense<0.000000e+00> : vector<2x8x8xf32>
    %25 = tpu.matmul %18, %21, %cst_31 {dimension_numbers = #tpu.dot_dimension_numbers<[2], [2], [1], [1], [0, 0, 0, 1, 1, 1], [0], [0]>} : vector<2x8x16xf32>, vector<2x8x16xf32>, vector<2x8x8xf32> -> vector<2x8x8xf32>
    "tpu.trace_stop"() : () -> ()
    %cst_32 = arith.constant dense<0xFF800000> : vector<2x8xf32>
    %26 = vector.multi_reduction <maximumf>, %25, %cst_32 [2] : vector<2x8x8xf32> to vector<2x8xf32>
    %27 = vector.shape_cast %26 : vector<2x8xf32> to vector<2x8x1xf32>
    %28 = vector.broadcast %27 : vector<2x8x1xf32> to vector<2x8x8xf32>
    %29 = arith.subf %25, %28 : vector<2x8x8xf32>
    %30 = math.exp %29 : vector<2x8x8xf32>
    %cst_33 = arith.constant dense<0.000000e+00> : vector<2x8xf32>
    %31 = vector.multi_reduction <add>, %30, %cst_33 [2] : vector<2x8x8xf32> to vector<2x8xf32>
    %32 = vector.shape_cast %31 : vector<2x8xf32> to vector<2x8x1xf32>
    "tpu.trace_start"() <{level = 10 : i32, message = "hqk,hkd->hqd"}> : () -> ()
    %cst_34 = arith.constant dense<0.000000e+00> : vector<2x8x16xf32>
    %33 = tpu.matmul %30, %24, %cst_34 {dimension_numbers = #tpu.dot_dimension_numbers<[2], [1], [1], [2], [0, 0, 0, 1, 1, 2], [0], [0]>} : vector<2x8x8xf32>, vector<2x8x16xf32>, vector<2x8x16xf32> -> vector<2x8x16xf32>
    "tpu.trace_stop"() : () -> ()
    %34 = tpu.reciprocal %32 : vector<2x8x1xf32> -> vector<2x8x1xf32>
    %35 = vector.broadcast %34 : vector<2x8x1xf32> to vector<2x8x16xf32>
    %36 = arith.mulf %33, %35 : vector<2x8x16xf32>
    %37 = vector.extract_strided_slice %36 {offsets = [0, 0, 0], sizes = [1, 8, 16], strides = [1, 1, 1]} : vector<2x8x16xf32> to vector<1x8x16xf32>
    %38 = vector.shape_cast %37 : vector<1x8x16xf32> to vector<8x16xf32>
    %c0_35 = arith.constant 0 : index
    %c0_36 = arith.constant 0 : index
    %c0_37 = arith.constant 0 : index
    %39 = vector.load %arg5[%c0_35, %c0_36, %c0_37] : memref<1x8x32xf32, #tpu.memory_space<vmem>>, vector<1x8x16xf32>
    %40 = vector.shape_cast %39 : vector<1x8x16xf32> to vector<8x16xf32>
    %41 = vector.shape_cast %38 : vector<8x16xf32> to vector<1x8x16xf32>
    tpu.vector_store %arg5[%c0_35, %c0_36, %c0_37], %41 {strides = array<i32>} : memref<1x8x32xf32, #tpu.memory_space<vmem>>, vector<1x8x16xf32>,
    %42 = vector.extract_strided_slice %36 {offsets = [1, 0, 0], sizes = [1, 8, 16], strides = [1, 1, 1]} : vector<2x8x16xf32> to vector<1x8x16xf32>
    %43 = vector.shape_cast %42 : vector<1x8x16xf32> to vector<8x16xf32>
    %c0_38 = arith.constant 0 : index
    %c0_39 = arith.constant 0 : index
    %c16 = arith.constant 16 : index
    %44 = vector.load %arg5[%c0_38, %c0_39, %c16] : memref<1x8x32xf32, #tpu.memory_space<vmem>>, vector<1x8x16xf32>
    %45 = vector.shape_cast %44 : vector<1x8x16xf32> to vector<8x16xf32>
    %46 = vector.shape_cast %43 : vector<8x16xf32> to vector<1x8x16xf32>
    tpu.vector_store %arg5[%c0_38, %c0_39, %c16], %46 {strides = array<i32>} : memref<1x8x32xf32, #tpu.memory_space<vmem>>, vector<1x8x16xf32>,
    return
  }
  func.func @transform_0(%arg0: i32, %arg1: i32) -> (i32, i32, i32, i32) {
    %c0_i32 = arith.constant 0 : i32
    %c0_i32_0 = arith.constant 0 : i32
    %c0_i32_1 = arith.constant 0 : i32
    %c0_i32_2 = arith.constant 0 : i32
    return %arg0, %c0_i32, %c0_i32_0, %c0_i32_1 : i32, i32, i32, i32
  }
  func.func @transform_1(%arg0: i32, %arg1: i32) -> (i32, i32, i32, i32) {
    %c0_i32 = arith.constant 0 : i32
    %c0_i32_0 = arith.constant 0 : i32
    %c0_i32_1 = arith.constant 0 : i32
    %c0_i32_2 = arith.constant 0 : i32
    %c0_i32_3 = arith.constant 0 : i32
    return %c0_i32, %c0_i32_0, %c0_i32_1, %c0_i32_2 : i32, i32, i32, i32
  }
  func.func @transform_2(%arg0: i32, %arg1: i32) -> (i32, i32, i32, i32) {
    %c0_i32 = arith.constant 0 : i32
    %c0_i32_0 = arith.constant 0 : i32
    %c0_i32_1 = arith.constant 0 : i32
    %c0_i32_2 = arith.constant 0 : i32
    %c0_i32_3 = arith.constant 0 : i32
    return %c0_i32, %c0_i32_0, %c0_i32_1, %c0_i32_2 : i32, i32, i32, i32
  }
  func.func @transform_3(%arg0: i32, %arg1: i32) -> (i32, i32, i32) {
    %c0_i32 = arith.constant 0 : i32
    %c0_i32_0 = arith.constant 0 : i32
    return %arg0, %arg1, %c0_i32 : i32, i32, i32
  }
}

</mosaic_0001>

<bundles_post_ra>
// kernel: tpu_custom_call.1
= control target key start
LH: loop header
LB: loop body
LE: loop exit
PB: predicated region body
PF: predicated region fallthrough
CT: control target
= control target key end

     0   :  { %8 = vsyncpa [#allocation3], 0  ;;  %s1827_s0 = inlined_call_operand.hbm [shape: f32[2,2,8,16], index: 0, kind: input, shape index: {}]   ;;  %s1828_s1 = inlined_call_operand.hbm [shape: f32[3,2,16,16], index: 1, kind: input, shape index: {}]   ;;  %s1829_s2 = inlined_call_operand.vmem [shape: f32[3,2,1,16], index: 2, kind: input, shape index: {}]   ;;  %s1830_s3 = inlined_call_operand.hbm [shape: f32[2,8,32], index: 3, kind: output, shape index: {}]  }
   0x1   :  { %10 = vsyncpa [#allocation3 + $0x1], 0 }
   0x2   :  { %11 = vsyncpa [#allocation6], 0 }
   0x3   :  { %12 = vsyncpa [#allocation4], 0 }
   0x4   :  { %14 = vsyncpa [#allocation4 + $0x1], 0  ;;  %s1544_s12 = smov 0   ;;  %s1546_s13 = smov 0  }
   0x5   :  { %s1548_s14 = smov 0   ;;  %s1550_s15 = smov 0  }
   0x6   :  { %s1552_s16 = smov 0   ;;  %s1554_s17 = smov 0  }
   0x7 LB: > { %s1137_s18 = sadd.s32 4294967295, %s1513_s17   ;;  %s1138_s19 = sadd.s32 4294967294, %s1513_s17   ;;  %s1513_s17 = sphi %s1554_s17, %s20_s17   ;;  %s1509_s16 = sphi %s1552_s16, %s1854_s16   ;;  %s1505_s15 = sphi %s1550_s15, %s1853_s15   ;;  %s1501_s14 = sphi %s1548_s14, %s1852_s14   ;;  %s1497_s13 = sphi %s1546_s13, %s1851_s13   ;;  %s1493_s12 = sphi %s1544_s12, %s1850_s12  }
   0x8   : > { %p52_p0 = scmp.ne.s32.totalorder %s1497_s13, %s1493_s12  ;;  %p1578_p1 = scmp.eq.s32.totalorder %s1137_s18, 0 }
   0x9   : > { %p1582_p2 = scmp.eq.s32.totalorder %s1137_s18, 1  ;;  %p126_p3 = scmp.eq.s32.totalorder %s1138_s19, 1 }
   0xa   : > { %s1835_s20 = scalar_select %p1578_p1, 1, 0 }
   0xb   : > { %s1836_s21 = scalar_select %p1582_p2, 1, 0 }
   0xc   : > { %p1588_p4 = por %p1578_p1, %p52_p0  ;;  %p1139_p5 = scmp.ge.s32.totalorder %s1513_s17, 1 }
   0xd   : > { %p1593_p6 = por %p126_p3, %p52_p0  ;;  %p133_p7 = scmp.lt.s32.totalorder %s1513_s17, 3 }
   0xe   : > { %s1837_s22 = scalar_select %p1588_p4, 1, 0 }
   0xf   : > { %s1838_s23 = scalar_select %p1593_p6, 1, 0 }
  0x10   : > { %p1598_p8 = pnand %p1139_p5, %p133_p7  ;;  %s1515_s25 = smov [#allocation5]  }
  0x11   : > { %s145_s26 = sshll.u32 %s1515_s25, 4  ;;  %s32_s28 = sadd.s32 1, %s1509_s16  ;;  %s146_s26 = int_to_ptr.vmem [resolvable:$true] %s145_s26 }
  0x12   : > { %s1839_s24 = scalar_select %p1598_p8, 1, 0 }
  0x13   : > { %p1290_p9 = pneg %p1598_p8  ;;  %s1369_s4 = scalar_lea.hbm %s1828_s1, 1536 }
  0x14   : > { %p1370_p12 = scmp.ne.s32.totalorder %s1828_s1, %s1369_s4  ;;  %p1376_p5 = scmp.lt.u32.totalorder %s1369_s4, %s1828_s1 }
  0x15   : > { %p1607_p11 = pnand %p1290_p9, %p1578_p1 }
  0x17   : > { %p1371_p13 = pneg %p1607_p11 }
  0x19   : > { %p1372_p0 = pnand %p1371_p13, %p1370_p12 }
  0x1b   : > { %p1373_p3 = pneg %p1372_p0 }
  0x1d   : > { %p1378_p7 = pnand %p1376_p5, %p1373_p3 }
  0x1f   : > { %1381 = shalt.err (!%p1378_p7)
}
  0x20   : > { %s1382_s9 = scalar_lea.vmem %s146_s26, 1536  ;;  %p1390_p1 = scmp.lt.s32.totalorder %s146_s26, %s146_s26 }
  0x21   : > { %p1383_p9 = scmp.ne.s32.totalorder %s146_s26, %s1382_s9  ;;  %p1391_p4 = scmp.lt.s32.totalorder %s1382_s9, %s1382_s9 }
  0x23   : > { %p1385_p10 = pnand %p1383_p9, %p1371_p13  ;;  %p1392_p8 = por %p1391_p4, %p1390_p1 }
  0x25   : > { %p1386_p6 = pneg %p1385_p10 }
  0x27   : > { %p1393_p2 = pnand %p1392_p8, %p1386_p6 }
  0x29   : > { %1396 = shalt.err (!%p1393_p2)
}
  0x2a   : > { %s1516_s10 = smov 128   ;;  %s1517_s11 = smov 8  }
  0x2b   : > { %1293 = dma.hbm_to_vmem [thread:$0]  (!%p1607_p11), %s1828_s1, 1536, %s146_s26, [#allocation6], %s1516_s10, %s1516_s10, %s1517_s11  }
  0x2c   : > { %p34_p1 = scmp.ge.s32.totalorder %s32_s28, 2  ;;  %s39_s25 = sadd.s32 1, %s1501_s14 }
  0x2d   : > { %p46_p2 = scmp.ne.s32.totalorder %s1501_s14, %s1497_s13  ;;  %p47_p4 = scmp.eq.s32.totalorder %s1513_s17, 0 }
  0x2e   : > { %s1856_s28 = smov (%p34_p1, %s32_s28), 0  ;;  %p1842_p8 = scmp.ne.s32.totalorder %s1836_s21, 0 }
  0x2f   : > { %p1637_p6 = por %p47_p4, %p46_p2  ;;  %s36_s30 = ssub.s32 %s1509_s16, %s1856_s28 }
  0x30   : > { %p1643_p10 = por %p1842_p8, %p46_p2  ;;  %p1303_p12 = scmp.lt.s32.totalorder %s1513_s17, 2 }
  0x31   : > { %p37_p11 = scmp.eq.s32.totalorder %s36_s30, 0  ;;  %s162_s26 = sand.u32 1, %s1501_s14  }
  0x32   : > { %s1142_s4 = sshll.u32 %s162_s26, 4  ;;  %s1175_s6 = sshll.u32 %s1509_s16, 8 }
  0x33   : > { %s1652_s5 = scalar_select %p37_p11, %s1501_s14, %s39_s25  }
  0x34   : > { %s1658_s9 = scalar_lea.hbm %s1827_s0, %s1175_s6  ;;  %s166_s21 = scalar_lea.vmem [#allocation2], %s1142_s4 }
  0x35   : > { %s173_s18 = sshll.u32 %s166_s21, 4  ;;  %p1664_p13 = pnand %p1303_p12, %p1637_p6  ;;  %s1660_s18 = int_to_ptr.vmem [resolvable:$true] %s173_s18 }
  0x36   : > { %s1668_s25 = scalar_lea.sflag [#allocation3], %s162_s26  ;;  %s1397_s30 = scalar_lea.hbm %s1658_s9, 256 }
  0x37   : > { %p1398_p0 = scmp.ne.s32.totalorder %s1658_s9, %s1397_s30  ;;  %p1399_p3 = pneg %p1664_p13 }
  0x38   : > { %s1402_s29 = scalar_lea.hbm %s1827_s0, 512  ;;  %p1403_p9 = scmp.lt.u32.totalorder %s1658_s9, %s1827_s0 }
  0x39   : > { %p1400_p5 = pnand %p1399_p3, %p1398_p0  ;;  %p1404_p1 = scmp.lt.u32.totalorder %s1402_s29, %s1397_s30 }
  0x3a   : > { %p1406_p4 = scmp.lt.u32.totalorder %s1397_s30, %s1658_s9 }
  0x3b   : > { %p1401_p7 = pneg %p1400_p5  ;;  %p1405_p2 = por %p1404_p1, %p1403_p9 }
  0x3d   : > { %p1407_p6 = por %p1406_p4, %p1405_p2 }
  0x3f   : > { %p1408_p8 = pnand %p1407_p6, %p1401_p7 }
  0x41   : > { %1411 = shalt.err (!%p1408_p8)
}
  0x42   : > { %s1412_s26 = scalar_lea.vmem %s1660_s18, 256  ;;  %s1518_s21 = smov [#allocation2]  }
  0x43   : > { %p1413_p12 = scmp.ne.s32.totalorder %s1660_s18, %s1412_s26  ;;  %s1417_s4 = sshll.u32 %s1518_s21, 4  ;;  %s1418_s4 = int_to_ptr.vmem [resolvable:$false] %s1417_s4 }
  0x44   : > { %s1419_s6 = scalar_lea.vmem %s1418_s4, 512  ;;  %p1420_p5 = scmp.lt.s32.totalorder %s1660_s18, %s1418_s4 }
  0x45   : > { %p1415_p11 = pnand %p1413_p12, %p1399_p3  ;;  %p1421_p9 = scmp.lt.s32.totalorder %s1419_s6, %s1412_s26 }
  0x47   : > { %p1416_p0 = pneg %p1415_p11  ;;  %p1422_p1 = por %p1421_p9, %p1420_p5 }
  0x49   : > { %p1423_p2 = pnand %p1422_p1, %p1416_p0 }
  0x4b   : > { %1426 = shalt.err (!%p1423_p2)
}
  0x4c   : > { %1297 = dma.hbm_to_vmem [thread:$0]  (!%p1664_p13), %s1658_s9, 256, %s1660_s18, %s1668_s25, %s1516_s10, %s1516_s10, %s1517_s11  }
  0x4d   : > { %p1845_p3 = scmp.ne.s32.totalorder %s1839_s24, 0 }
  0x4e   : > { %s1702_s30 = sand.u32 (!%p1845_p3), 1, %s1497_s13   ;;  %p1846_p7 = scmp.ne.s32.totalorder (!%p1845_p3), %s1837_s22, 0 }
  0x4f   : > { %185 = sbr.rel (%p1845_p3) target bundleno = 1031 (0x407), region = 32  ;;  %s1146_s29 = sshll.u32 (!%p1845_p3), %s1702_s30, 4 }
  0x50   : > { %s188_s7 = scalar_lea.sflag (!%p1845_p3), [#allocation3], %s1702_s30  ;;  %s191_s8 = scalar_lea.vmem (!%p1845_p3), [#allocation2], %s1146_s29 }
  0x56   : > { %1480 = dma.done.wait (%p1846_p7), %s188_s7, 256  }
  0x57   : > { %1482 = vsyncadd (%p1846_p7), %s188_s7, 4294967040  ;;  %p1847_p4 = scmp.ne.s32.totalorder %s1835_s20, 0 }
  0x59   : > { %1484 = dma.done.wait (%p1847_p4), [#allocation6], 1536  }
  0x5a   : > { %1486 = vsyncadd (%p1847_p4), [#allocation6], 4294965760  ;;  %v1519_v0 = vmov 0.0|0.0   ;;  %vm1520_vm0 = vmmov 0   ;;  %v1521_v1 = vmov 0.0   ;;  %v222_v2 = vld [vmem:[#allocation5 + $0x10] sm:$0xff] }
  0x5b   : > { %1267 = vmatprep.subr.bf16.mxu1 %v1519_v0  ;;  %1213 = vmatprep.mubr.msk.f32.mxu1 %vm1520_vm0, %v1521_v1  ;;  %v223_v3 = vld [vmem:[#allocation5 + $0x18] sm:$0xff]  ;;  %v220_v5 = vld [vmem:[#allocation5] sm:$0xff]  ;;  %v221_v6 = vld [vmem:[#allocation5 + $0x8] sm:$0xff]  ;;  %vm254_vm1 = vcmask 130048   ;;  %vm857_vm2 = vcmask 64512   ;;  %s1148_s6 = sshll.u32 %s1702_s30, 3 }
  0x5c   : > { %1264 = vmatprep.subr.bf16.mxu0 %v1519_v0  ;;  %1206 = vmatprep.mubr.msk.f32.mxu0 %vm1520_vm0, %v1521_v1  ;;  %v1268_v4 = vpack.c.bf16 %v223_v3, %v222_v2  ;;  %v227_v7 = vld [vmem:[#allocation5 + $0x30] sm:$0xff]  ;;  %v1265_v8 = vpack.c.bf16 %v221_v6, %v220_v5  ;;  %v228_v9 = vld [vmem:[#allocation5 + $0x38] sm:$0xff]  ;;  %v225_v10 = vld [vmem:[#allocation5 + $0x20] sm:$0xff]  ;;  %s1522_s29 = smov 16   ;;  %s217_s7 = scalar_lea.vmem [#allocation7], %s1148_s6  ;;  %vm1031_vm3 = vcmask 261248  }
  0x5d   : > { %v219_v11 = vld [vmem:[%s191_s8 + $0x8] sm:$0xff]  ;;  %v1274_v12 = vpack.c.bf16 %v228_v9, %v227_v7  ;;  %v232_v14 = vld [vmem:[#allocation5 + $0x50] sm:$0xff]  ;;  %v230_v19 = vld [vmem:[#allocation5 + $0x40] sm:$0xff]  ;;  %s1048_s20 = sshll.u32 %s217_s7, 4  ;;  %s1034_s11 = scalar_lea.sflag [#allocation4], %s1702_s30  ;;  %s1780_s20 = int_to_ptr.vmem [resolvable:$true] %s1048_s20 }
  0x5e   : > { %1269 = vmatpush3.bf16.msra.mxu1 %v1268_v4  ;;  %v226_v13 = vld [vmem:[#allocation5 + $0x28] sm:$0xff]  ;;  %1266 = vmatpush3.bf16.msra.mxu0 %v1265_v8  ;;  %v233_v15 = vld [vmem:[#allocation5 + $0x58] sm:$0xff]  ;;  %v218_v16 = vld [vmem:[%s191_s8] sm:$0xff]  ;;  %s1172_s8 = sshll.u32 %s1505_s15, 7  ;;  %s1427_s9 = scalar_lea.vmem %s1780_s20, 128 }
  0x5f   : > { %1273 = vmatprep.subr.bf16.mxu1 %v1519_v0  ;;  %1270 = vmatprep.subr.bf16.mxu0 %v1519_v0  ;;  %v1271_v17 = vpack.c.bf16 %v226_v13, %v225_v10  ;;  %v1280_v18 = vpack.c.bf16 %v233_v15, %v232_v14  ;;  %v231_v20 = vld [vmem:[#allocation5 + $0x48] sm:$0xff]  ;;  %v1158_v24 = vld [vmem:[%s1829_s2 + $0x3] ss:$0 sm:$0xff]  ;;  %v1157_v28 = vld [vmem:[%s1829_s2 + $0x2] ss:$0 sm:$0xff]  ;;  %s1778_s10 = scalar_lea.hbm %s1830_s3, %s1172_s8  ;;  %p1428_p13 = scmp.ne.s32.totalorder %s1780_s20, %s1427_s9 }
  0x60   : > { %v1277_v21 = vpack.c.bf16 %v231_v20, %v230_v19  ;;  %v1154_v29 = vld [vmem:[%s1829_s2 + $0x1] ss:$0 sm:$0xff]  ;;  %v1153_v32 = vld [vmem:[%s1829_s2] ss:$0 sm:$0xff]  ;;  %v1162_v34 = vld [vmem:[%s1829_s2 + $0x5] ss:$0 sm:$0xff] }
  0x61   : > { %1214 = vmatmul.mubr.msk.f32.vlgmr.msra.gmra.mrb[0].mxu1 %vm254_vm1, %v219_v11  ;;  %1207 = vmatmul.mubr.msk.f32.vlgmr.msra.gmra.mrb[0].mxu0 %vm254_vm1, %v218_v16  ;;  %v1161_v42 = vld [vmem:[%s1829_s2 + $0x4] ss:$0 sm:$0xff]  ;;  %p1429_p6 = pnand %p1428_p13, %p1643_p10  ;;  %s1523_s15 = smov [#allocation7]  }
  0x62   : > { %1275 = vmatpush3.bf16.msra.mxu1 %v1274_v12  ;;  %1227 = vmatprep.mubr.msk.f32.mxu1 %vm1520_vm0, %v1521_v1  ;;  %s1431_s18 = sshll.u32 %s1523_s15, 4  ;;  %s1432_s18 = int_to_ptr.vmem [resolvable:$false] %s1431_s18 }
  0x63   : > { %1279 = vmatprep.subr.bf16.mxu1 %v1519_v0  ;;  %1272 = vmatpush3.bf16.msra.mxu0 %v1271_v17  ;;  %p1430_p8 = pneg %p1429_p6  ;;  %s1433_s19 = scalar_lea.vmem %s1432_s18, 256 }
  0x64   : > { %1220 = vmatprep.mubr.msk.f32.mxu0 %vm1520_vm0, %v1521_v1  ;;  %1276 = vmatprep.subr.bf16.mxu0 %v1519_v0  ;;  %p1434_p12 = scmp.lt.s32.totalorder %s1780_s20, %s1432_s18  ;;  %p1435_p11 = scmp.lt.s32.totalorder %s1433_s19, %s1427_s9 }
  0x65   : > { %1228 = vmatmul.mubr.msk.f32.vlgmr.msra.gmra.mrb[2].mxu1 %vm254_vm1, %v219_v11 }
  0x66   : > { %1281 = vmatpush3.bf16.msra.mxu1 %v1280_v18  ;;  %1241 = vmatprep.mubr.msk.f32.mxu1 %vm1520_vm0, %v1521_v1  ;;  %p1436_p0 = por %p1435_p11, %p1434_p12 }
  0x67   : > { %1221 = vmatmul.mubr.msk.f32.vlgmr.msra.gmra.mrb[2].mxu0 %vm254_vm1, %v218_v16  ;;  %1249 = vmatprep.subr.mxu1 %v1521_v1 }
  0x68   : > { %1234 = vmatprep.mubr.msk.f32.mxu0 %vm1520_vm0, %v1521_v1  ;;  %1278 = vmatpush3.bf16.msra.mxu0 %v1277_v21  ;;  %p1437_p5 = pnand %p1436_p0, %p1430_p8 }
  0x69   : > { %1242 = vmatmul.mubr.msk.f32.vlgmr.msra.gmra.mrb[4].mxu1 %vm254_vm1, %v219_v11  ;;  %1244 = vmatprep.subr.mxu0 %v1521_v1 }
  0x6a   : > { %1251 = vmatprep.mubr.msk.f32.mxu1 %vm1520_vm0, %v1521_v1 }
  0x6b   : > { %1235 = vmatmul.mubr.msk.f32.vlgmr.msra.gmra.mrb[4].mxu0 %vm254_vm1, %v218_v16 }
  0x6c   : > { %1246 = vmatprep.mubr.msk.f32.mxu0 %vm1520_vm0, %v1521_v1 }
 0x134   : > { %v397_v22 = vpop.f32.mrb[0].mxu1  ;;  %v324_v25 = vpop.f32.mrb[0].mxu0 }
 0x135   : > { %v1215_v23 = vpop.f32.mrb[1].mxu1  ;;  %v1208_v26 = vpop.f32.mrb[1].mxu0  ;;  %v398_v37 = vadd.f32 %v1154_v29, %v397_v22  ;;  %v325_v38 = vadd.f32 %v1153_v32, %v324_v25 }
 0x138   : > { %v549_v27 = vpop.f32.mrb[2].mxu1 }
 0x139   : > { %v550_v30 = vadd.f32 %v1158_v24, %v549_v27  ;;  %v1229_v31 = vpop.f32.mrb[3].mxu1 }
 0x13a   : > { %v479_v33 = vpop.f32.mrb[2].mxu0 }
 0x13b   : > { %1250 = vmatpush3.xpose.msk.msra.mxu1 %vm254_vm1, %v550_v30  ;;  %v480_v35 = vadd.f32 %v1157_v28, %v479_v33  ;;  %v1222_v36 = vpop.f32.mrb[3].mxu0 }
 0x13c   : > { %v701_v39 = vpop.f32.mrb[4].mxu1  ;;  %1259 = vmatprep.subr.mxu1 %v1521_v1 }
 0x13d   : > { %1245 = vmatpush3.xpose.msk.msra.mxu0 %vm254_vm1, %v480_v35  ;;  %v702_v40 = vadd.f32 %v1162_v34, %v701_v39  ;;  %v1243_v41 = vpop.f32.mrb[5].mxu1 }
 0x13e   : > { %1252 = vmatmul.mubr.msk.f32.vlgmr.msra.gmra.mrb[6].mxu1 %vm254_vm1, %v398_v37  ;;  %1254 = vmatprep.subr.mxu0 %v1521_v1  ;;  %v631_v43 = vpop.f32.mrb[4].mxu0 }
 0x13f   : > { %1260 = vmatpush3.msra.mxu1 %v702_v40  ;;  %1261 = vmatprep.mubr.msk.f32.mxu1 %vm1520_vm0, %v1521_v1  ;;  %v632_v44 = vadd.f32 %v1161_v42, %v631_v43  ;;  %v1236_v45 = vpop.f32.mrb[5].mxu0 }
 0x140   : > { %1247 = vmatmul.mubr.msk.f32.vlgmr.msra.gmra.mrb[6].mxu0 %vm254_vm1, %v325_v38 }
 0x141   : > { %1256 = vmatprep.mubr.msk.f32.mxu0 %vm1520_vm0, %v1521_v1  ;;  %1255 = vmatpush3.msra.mxu0 %v632_v44 }
 0x211   : > { %v853_v46 = vpop.f32.mrb[6].mxu1 }
 0x212   : > { %v1253_v47 = vpop.f32.mrb[7].mxu1  ;;  %v861_v48 = vsel %vm857_vm2, %v853_v46, -inf }
 0x213   : > { %862 = vmax.xlane.f32.xlu0 %v861_v48  ;;  %v777_v49 = vpop.f32.mrb[6].mxu0 }
 0x214   : > { %v858_v50 = vsel %vm857_vm2, %v777_v49, -inf  ;;  %v1248_v51 = vpop.f32.mrb[7].mxu0 }
 0x217   : > { %859 = vmax.xlane.f32.xlu0 %v858_v50 }
 0x2a0   : > { %v863_v52 = vpop.xlane.xlu0 %862 }
 0x2a1   : > { %v865_v53 = vsub.f32 %v853_v46, %v863_v52 }
 0x2a3   : > { %v868_v54 = vmul.f32 1.442695, %v865_v53 }
 0x2a4   : > { %v860_v55 = vpop.xlane.xlu0 %859 }
 0x2a5   : > { %1361 = vpow2.f32 %v868_v54  ;;  %v864_v56 = vsub.f32 %v777_v49, %v860_v55 }
 0x2a7   : > { %v866_v57 = vmul.f32 1.442695, %v864_v56 }
 0x2a9   : > { %1363 = vpow2.f32 %v866_v57 }
 0x2af   : > { %v1362_v58 = vpop.eup %1361 }
 0x2b0   : > { %1262 = vmatmul.mubr.msk.f32.vlgmr.msra.gmra.mrb[8].mxu1 %vm857_vm2, %v1362_v58  ;;  %v873_v59 = vsel %vm857_vm2, %v1362_v58, 0.0 }
 0x2b1   : > { %874 = vadd.xlane.f32.xlu1 %v873_v59 }
 0x2b3   : > { %v1364_v60 = vpop.eup %1363 }
 0x2b4   : > { %1257 = vmatmul.mubr.msk.f32.vlgmr.msra.gmra.mrb[8].mxu0 %vm857_vm2, %v1364_v60  ;;  %v870_v61 = vsel %vm857_vm2, %v1364_v60, 0.0 }
 0x2b5   : > { %871 = vadd.xlane.f32.xlu1 %v870_v61 }
 0x33e   : > { %v875_v62 = vpop.xlane.xlu1 %874 }
 0x33f   : > { %1365 = vrcp.f32 %v875_v62 }
 0x342   : > { %v872_v63 = vpop.xlane.xlu1 %871 }
 0x343   : > { %1367 = vrcp.f32 %v872_v63 }
 0x349   : > { %v1366_v0 = vpop.eup %1365 }
 0x34d   : > { %v1368_v4 = vpop.eup %1367 }
 0x383   : > { %v1018_v1 = vpop.f32.mrb[8].mxu1 }
 0x384   : > { %v1025_v2 = vmul.f32 %v1366_v0, %v1018_v1  ;;  %v1263_v3 = vpop.f32.mrb[9].mxu1 }
 0x386   : > { %1028 = vrot.lane.b32.xlu0 %v1025_v2, %s1522_s29 }
 0x387   : > { %v945_v5 = vpop.f32.mrb[8].mxu0 }
 0x388   : > { %v1024_v6 = vmul.f32 %v1368_v4, %v945_v5  ;;  %v1258_v7 = vpop.f32.mrb[9].mxu0 }
 0x38a   : > { %1026 = vst.msk [vmem:[%s217_s7] sm:$0xff] %vm254_vm1, %v1024_v6 }
 0x3f8   : > { %v1029_v8 = vpop.permute.xlu0 %1028 }
 0x3f9   : > { %1032 = vst.msk [vmem:[%s217_s7] sm:$0xff] %vm1031_vm3, %v1029_v8 }
 0x3fa   : > { %1440 = shalt.err (!%p1437_p5)
}
 0x3fb   : > { %s1441_s30 = scalar_lea.hbm %s1778_s10, 128  ;;  %s1445_s21 = scalar_lea.hbm %s1830_s3, 256 }
 0x3fc   : > { %p1442_p9 = scmp.ne.s32.totalorder %s1778_s10, %s1441_s30  ;;  %p1446_p3 = scmp.lt.u32.totalorder %s1778_s10, %s1830_s3 }
 0x3fd   : > { %p1447_p7 = scmp.lt.u32.totalorder %s1445_s21, %s1441_s30  ;;  %p1449_p13 = scmp.lt.u32.totalorder %s1441_s30, %s1778_s10 }
 0x3fe   : > { %p1443_p1 = pnand %p1442_p9, %p1643_p10 }
 0x3ff   : > { %p1448_p4 = por %p1447_p7, %p1446_p3 }
 0x400   : > { %p1444_p2 = pneg %p1443_p1 }
 0x401   : > { %p1450_p6 = por %p1449_p13, %p1448_p4 }
 0x403   : > { %p1451_p8 = pnand %p1450_p6, %p1444_p2 }
 0x405   : > { %1454 = shalt.err (!%p1451_p8)
}
 0x406   : > { %1288 = dma.vmem_to_hbm [thread:$0]  (%p1643_p10), %s1780_s20, 128, %s1778_s10, %s1034_s11  }
 0x407 PF: > { %s1060_s29 = sand.u32 1, %s1493_s12   ;;  %p1848_p12 = scmp.ne.s32.totalorder %s1838_s23, 0 }
 0x408   : > { %p1849_p11 = scmp.ge.s32.totalorder %s1513_s17, 2  ;;  %s1061_s7 = scalar_lea.sflag [#allocation4], %s1060_s29 }
 0x40a   : > { %p1299_p0 = pnand %p1849_p11, %p1848_p12 }
 0x40c   : > { %1488 = dma.done.wait (!%p1299_p0), %s1061_s7, 128  }
 0x40d   : > { %1490 = vsyncadd (!%p1299_p0), %s1061_s7, 4294967168  ;;  %s20_s17 = sadd.s32 1, %s1513_s17   ;;  %s1850_s12 = smov %s1497_s13 }
 0x40e   : > { %p17_p5 = scmp.ge.s32.totalorder %s20_s17, 4   ;;  %s1851_s13 = smov %s1501_s14 }
 0x40f   : > { %s1852_s14 = smov %s1652_s5  ;;  %s1853_s15 = smov %s1509_s16 }
 0x410   : > { %s1854_s16 = smov %s1856_s28  ;;  %19 = sbr.rel (!%p17_p5) target bundleno = 7 (0x7), region = 85 }
 0x417   :  { %1066 = vsyncpa [#allocation3], 1 }
 0x418   :  { %1068 = vsyncpa [#allocation3 + $0x1], 1 }
 0x419   :  { %1069 = vsyncpa [#allocation6], 1 }
 0x41a   :  { %1070 = vsyncpa [#allocation4], 1 }
 0x41b   :  { %1072 = vsyncpa [#allocation4 + $0x1], 1 }

</bundles_post_ra>
